<compile_context>
chip_gen: v6e
topology: v6e:2x2x1
jax: 0.10.0
libtpu: 0.0.40
codegen_flags: <defaults>
</compile_context>

<pallas_src>
import jax
import jax.numpy as jnp
from jax.experimental import pallas as pl
from jax.experimental.pallas import tpu as pltpu


def _conv1d_kernel(x_ref, w_ref, o_ref, carry_ref):
    """One (batch-block i, time-tile j) grid point.

    x_ref:     (nb, C_in, tt)        -- lane-aligned input tile (time on lanes)
    w_ref:     (C_out, K*C_in)       -- taps fused along the contraction axis
    o_ref:     (nb, C_out, tt)       -- lane-dense output tile
    carry_ref: (nb, C_in, max(K-1,1)) VMEM scratch -- last K-1 input columns of
               the previous time tile (the halo), carried across the sequential
               time-tile axis.
    """
    nb, c_in, tt = x_ref.shape
    k = w_ref.shape[-1] // c_in

    # First time tile of a batch block: the halo represents columns left of the
    # utterance start; those outputs are sliced off in the wrapper, but zero the
    # carry anyway so no stale data propagates.
    @pl.when(pl.program_id(1) == 0)
    def _():
        carry_ref[...] = jnp.zeros_like(carry_ref)

    w = w_ref[...]                                   # resident, loaded once

    for b in range(nb):                              # small, static unroll
        x_b = x_ref[b]                               # (C_in, tt)
        if k > 1:
            halo_b = carry_ref[b]                    # (C_in, K-1) from prev tile
            carry_ref[b] = x_b[:, tt - (k - 1):]     # save halo for next tile
            # One halo window per tile; the K shifted operands are derived from
            # it (no per-tap unaligned ref slices).
            win_b = jnp.concatenate([halo_b, x_b], axis=-1)      # (C_in, tt+K-1)
            stacked_b = jnp.concatenate(
                [win_b[:, kk:kk + tt] for kk in range(k)], axis=0)  # (K*C_in, tt)
        else:
            stacked_b = x_b

        # Single MXU contraction of depth K*C_in, f32 accumulation.
        o_ref[b] = jnp.dot(w, stacked_b,
                           preferred_element_type=jnp.float32).astype(o_ref.dtype)


def _pick_n_block(n, t_out):
    """Pack several batch elements per grid step when output tiles are narrow,
    so each step does >= ~256 lanes of work (amortizes ~0.35us/step overhead)."""
    if t_out >= 256:
        return 1
    target = min(n, 32, max(1, 256 // max(t_out, 1)))
    nb = 1
    for d in range(1, target + 1):
        if n % d == 0:
            nb = d
    return nb


def _vmem_limit_bytes(est_bytes):
    """Generation-aware scoped-VMEM limit with compiler-scratch headroom."""
    cap = 64 * 1024 * 1024                      # conservative (v7x per-TC)
    try:
        info = pltpu.get_tpu_info()
        cap = int(getattr(info, "vmem_capacity_bytes", cap))
    except Exception:
        pass
    headroom_cap = cap - cap // 4               # leave ~25% for compiler scratch
    return int(min(max(32 * 1024 * 1024, 2 * est_bytes), headroom_cap))


def orthonormal_linear_forward(x_nct, weight, *,
                               compute_dtype=jnp.bfloat16, t_tile_max=512):
    """x_nct: (N, C_in, T); weight: (C_out, C_in, K)  (PyTorch Conv1d layout).

    Returns (N, C_out, T - K + 1) in x's dtype, matching nn.Conv1d(bias=False).
    compute_dtype: dtype fed to the MXU (bf16 by default; accumulation is f32).
    """
    n, c_in, t = x_nct.shape
    c_out, c_in_w, k = weight.shape
    assert c_in_w == c_in
    t_out = t - k + 1
    assert t_out >= 1

    out_dtype = x_nct.dtype
    if compute_dtype is None:
        compute_dtype = x_nct.dtype

    # --- time tiling --------------------------------------------------------
    # Clamp t_tile so the f32 (C_out, t_tile) result tile stays <= ~32 vregs.
    acc_budget_elems = 32 * 1024
    t_cap = max(128, (acc_budget_elems // max(c_out, 1)) // 128 * 128)
    t_tile = max(128, min(t_tile_max, t_cap))
    if t <= t_tile:
        tt, num_t_tiles = t, 1                  # single full-extent tile
    else:
        tt = t_tile                             # multiple of 128 -> unmasked vst
        num_t_tiles = pl.cdiv(t, tt)
    t_pad = num_t_tiles * tt                    # padded output/time extent

    # Output is "front-shifted" by K-1: padded output column p holds
    # out[p - (K-1)], so each output tile only needs its own x tile plus the
    # carried K-1 halo columns from the previous tile.  Valid outputs are
    # columns [K-1, K-1+t_out), sliced off at the end.

    # --- batch blocking for short utterances --------------------------------
    nb = _pick_n_block(n, t_out)

    # --- pad x tail to the tile grid (zeros only feed sliced-off outputs) ----
    if t_pad > t:
        x_nct = jnp.pad(x_nct, ((0, 0), (0, 0), (0, t_pad - t)))
    xc = x_nct.astype(compute_dtype)

    # Tiny weight rearrangement: (C_out, C_in, K) -> (C_out, K*C_in) so the K
    # taps fuse into one contraction; w2[:, kk*C_in + c] = weight[:, c, kk].
    w2 = jnp.transpose(weight, (0, 2, 1)).reshape(c_out, k * c_in).astype(compute_dtype)

    # --- VMEM budget (dtype-aware) ------------------------------------------
    isz = jnp.dtype(compute_dtype).itemsize
    osz = jnp.dtype(out_dtype).itemsize
    est_bytes = (2 * nb * c_in * tt * isz            # double-buffered x tiles
                 + 2 * c_out * k * c_in * isz        # weights
                 + 2 * nb * c_out * tt * osz         # double-buffered out tiles
                 + nb * c_in * max(k - 1, 1) * isz   # halo carry scratch
                 + (k + 1) * c_in * tt * isz         # per-b win/stacked temps
                 + c_out * tt * 4)                   # f32 matmul result
    vmem_limit = _vmem_limit_bytes(est_bytes)

    out_pad = pl.pallas_call(
        _conv1d_kernel,
        out_shape=jax.ShapeDtypeStruct((n, c_out, t_pad), out_dtype),
        grid=(n // nb, num_t_tiles),
        in_specs=[
            # x: bounded, lane-aligned tiles; each element DMA'd exactly once.
            pl.BlockSpec((nb, c_in, tt), lambda i, j: (i, 0, j)),
            # weights: block index never changes -> fetched once, resident.
            pl.BlockSpec((c_out, k * c_in), lambda i, j: (0, 0)),
        ],
        out_specs=pl.BlockSpec((nb, c_out, tt), lambda i, j: (i, 0, j)),
        scratch_shapes=[pltpu.VMEM((nb, c_in, max(k - 1, 1)), compute_dtype)],
        compiler_params=pltpu.CompilerParams(
            # Time axis is sequential (halo carry) -> "arbitrary"; batch axis
            # is independent -> "parallel" (sharded across TCs on v7x).
            dimension_semantics=("parallel", "arbitrary"),
            vmem_limit_bytes=vmem_limit,
        ),
    )(xc, w2)

    return out_pad[:, :, k - 1:k - 1 + t_out]


def orthonormal_linear_reference(x_nct, weight):
    """Plain-JAX reference for nn.Conv1d(bias=False), NCT layout (f32)."""
    k = weight.shape[2]
    t_out = x_nct.shape[2] - k + 1
    out = jnp.zeros((x_nct.shape[0], weight.shape[0], t_out), jnp.float32)
    for kk in range(k):
        out = out + jnp.einsum("nct,oc->not",
                               x_nct[:, :, kk:kk + t_out].astype(jnp.float32),
                               weight[:, :, kk].astype(jnp.float32))
    return out


# TODO(synk): constrain_orthonormal() is a training-time weight re-orthonormalization
# utility (host/XLA-side, not part of forward); it is not implemented as a Pallas kernel.


if __name__ == "__main__":
    key = jax.random.PRNGKey(0)
    k_x, k_w, k_x2, k_w1 = jax.random.split(key, 4)

    # Small shapes consistent with OrthonormalLinear(dim, bottleneck_dim, kernel_size).
    N, DIM, BOTTLENECK, KSIZE, T = 2, 32, 16, 3, 24

    bound = 1.0 / ((DIM * KSIZE) ** 0.5)
    weight = jax.random.uniform(k_w, (BOTTLENECK, DIM, KSIZE), jnp.float32, -bound, bound)

    # Test 1: single-tile, batch-blocked path; exact f32 compute.
    x1 = jax.random.normal(k_x, (N, DIM, T), dtype=jnp.float32)
    out1 = jax.block_until_ready(
        orthonormal_linear_forward(x1, weight, compute_dtype=jnp.float32))
    ref1 = orthonormal_linear_reference(x1, weight)
    assert out1.shape == (N, BOTTLENECK, T - KSIZE + 1)
    assert jnp.allclose(out1, ref1, atol=1e-4, rtol=1e-4), "mismatch (single tile, f32)"

    # Test 2: multi-tile path (halo carried across 128-wide time tiles); exact f32.
    T2 = 300
    x2 = jax.random.normal(k_x2, (N, DIM, T2), dtype=jnp.float32)
    out2 = jax.block_until_ready(
        orthonormal_linear_forward(x2, weight, compute_dtype=jnp.float32, t_tile_max=128))
    ref2 = orthonormal_linear_reference(x2, weight)
    assert out2.shape == (N, BOTTLENECK, T2 - KSIZE + 1)
    assert jnp.allclose(out2, ref2, atol=1e-4, rtol=1e-4), "mismatch (multi tile, f32)"

    # Test 3: default bf16-input MXU path (f32 accumulation), looser tolerance.
    out3 = jax.block_until_ready(
        orthonormal_linear_forward(x2, weight, t_tile_max=128))
    assert out3.shape == (N, BOTTLENECK, T2 - KSIZE + 1)
    assert jnp.allclose(out3, ref2, atol=5e-2, rtol=5e-2), "mismatch (multi tile, bf16)"

    # Test 4: kernel_size == 1 (pointwise) path.
    w1 = jax.random.uniform(k_w1, (BOTTLENECK, DIM, 1), jnp.float32,
                            -1.0 / DIM ** 0.5, 1.0 / DIM ** 0.5)
    out4 = jax.block_until_ready(
        orthonormal_linear_forward(x1, w1, compute_dtype=jnp.float32))
    ref4 = orthonormal_linear_reference(x1, w1)
    assert out4.shape == (N, BOTTLENECK, T)
    assert jnp.allclose(out4, ref4, atol=1e-4, rtol=1e-4), "mismatch (k=1)"

    print("KERNEL_OK")
</pallas_src>

<mosaic_0001>
module attributes {stable_mosaic.version = 11 : i64} {
  func.func @_conv1d_kernel(%arg0: i32, %arg1: i32, %arg2: memref<2x32x24xf32, #tpu.memory_space<vmem>>, %arg3: memref<16x96xf32, #tpu.memory_space<vmem>>, %arg4: memref<2x16x24xf32, #tpu.memory_space<vmem>>, %arg5: memref<2x32x2xf32, #tpu.memory_space<vmem>>) attributes {dimension_semantics = [#tpu.dimension_semantics<parallel>, #tpu.dimension_semantics<arbitrary>], iteration_bounds = array<i64: 1, 1>, scalar_prefetch = 0 : i64, scratch_operands = 1 : i64, tpu.core_type = #tpu.core_type<tc>, window_params = [{transform_indices = @transform_0, window_bounds = array<i64: 2, 32, 24>}, {pipeline_mode = #tpu.pipeline_mode<synchronous>, transform_indices = @transform_1, window_bounds = array<i64: 16, 96>}, {transform_indices = @transform_2, window_bounds = array<i64: 2, 16, 24>}]} {
    %c0_i32 = arith.constant 0 : i32
    %0 = arith.cmpi eq, %arg1, %c0_i32 : i32
    %1 = arith.extui %0 : i1 to i32
    %c0_i32_0 = arith.constant 0 : i32
    %2 = arith.cmpi ne, %1, %c0_i32_0 : i32
    scf.if %2 {
      %cst_26 = arith.constant 0.000000e+00 : f32
      %38 = vector.broadcast %cst_26 : f32 to vector<2x32x2xf32>
      %c0_27 = arith.constant 0 : index
      %c0_28 = arith.constant 0 : index
      %c0_29 = arith.constant 0 : index
      %39 = vector.load %arg5[%c0_27, %c0_28, %c0_29] : memref<2x32x2xf32, #tpu.memory_space<vmem>>, vector<2x32x2xf32>
      tpu.vector_store %arg5[%c0_27, %c0_28, %c0_29], %38 {strides = array<i32>} : memref<2x32x2xf32, #tpu.memory_space<vmem>>, vector<2x32x2xf32>,
    } else {
    }
    %c0 = arith.constant 0 : index
    %c0_1 = arith.constant 0 : index
    %3 = vector.load %arg3[%c0, %c0_1] : memref<16x96xf32, #tpu.memory_space<vmem>>, vector<16x96xf32>
    %c0_2 = arith.constant 0 : index
    %c0_3 = arith.constant 0 : index
    %c0_4 = arith.constant 0 : index
    %4 = vector.load %arg2[%c0_2, %c0_3, %c0_4] : memref<2x32x24xf32, #tpu.memory_space<vmem>>, vector<1x32x24xf32>
    %5 = vector.shape_cast %4 : vector<1x32x24xf32> to vector<32x24xf32>
    %c0_5 = arith.constant 0 : index
    %c0_6 = arith.constant 0 : index
    %c0_7 = arith.constant 0 : index
    %6 = vector.load %arg5[%c0_5, %c0_6, %c0_7] : memref<2x32x2xf32, #tpu.memory_space<vmem>>, vector<1x32x2xf32>
    %7 = vector.shape_cast %6 : vector<1x32x2xf32> to vector<32x2xf32>
    %8 = vector.extract_strided_slice %5 {offsets = [0, 22], sizes = [32, 2], strides = [1, 1]} : vector<32x24xf32> to vector<32x2xf32>
    %c0_8 = arith.constant 0 : index
    %c0_9 = arith.constant 0 : index
    %c0_10 = arith.constant 0 : index
    %9 = vector.load %arg5[%c0_8, %c0_9, %c0_10] : memref<2x32x2xf32, #tpu.memory_space<vmem>>, vector<1x32x2xf32>
    %10 = vector.shape_cast %9 : vector<1x32x2xf32> to vector<32x2xf32>
    %11 = vector.shape_cast %8 : vector<32x2xf32> to vector<1x32x2xf32>
    tpu.vector_store %arg5[%c0_8, %c0_9, %c0_10], %11 {strides = array<i32>} : memref<2x32x2xf32, #tpu.memory_space<vmem>>, vector<1x32x2xf32>,
    %12 = tpu.concatenate %7, %5 in 1 : vector<32x2xf32>, vector<32x24xf32> -> vector<32x26xf32>
    %13 = vector.extract_strided_slice %12 {offsets = [0, 0], sizes = [32, 24], strides = [1, 1]} : vector<32x26xf32> to vector<32x24xf32>
    %14 = vector.extract_strided_slice %12 {offsets = [0, 1], sizes = [32, 24], strides = [1, 1]} : vector<32x26xf32> to vector<32x24xf32>
    %15 = vector.extract_strided_slice %12 {offsets = [0, 2], sizes = [32, 24], strides = [1, 1]} : vector<32x26xf32> to vector<32x24xf32>
    %16 = tpu.concatenate %13, %14, %15 in 0 : vector<32x24xf32>, vector<32x24xf32>, vector<32x24xf32> -> vector<96x24xf32>
    %cst = arith.constant dense<0.000000e+00> : vector<16x24xf32>
    %17 = tpu.matmul %3, %16, %cst {dimension_numbers = #tpu.dot_dimension_numbers<[1], [0], [0], [1], [0, 0, 1, 1], [], []>} : vector<16x96xf32>, vector<96x24xf32>, vector<16x24xf32> -> vector<16x24xf32>
    %c0_11 = arith.constant 0 : index
    %c0_12 = arith.constant 0 : index
    %c0_13 = arith.constant 0 : index
    %18 = vector.load %arg4[%c0_11, %c0_12, %c0_13] : memref<2x16x24xf32, #tpu.memory_space<vmem>>, vector<1x16x24xf32>
    %19 = vector.shape_cast %18 : vector<1x16x24xf32> to vector<16x24xf32>
    %20 = vector.shape_cast %17 : vector<16x24xf32> to vector<1x16x24xf32>
    tpu.vector_store %arg4[%c0_11, %c0_12, %c0_13], %20 {strides = array<i32>} : memref<2x16x24xf32, #tpu.memory_space<vmem>>, vector<1x16x24xf32>,
    %c1 = arith.constant 1 : index
    %c0_14 = arith.constant 0 : index
    %c0_15 = arith.constant 0 : index
    %21 = vector.load %arg2[%c1, %c0_14, %c0_15] : memref<2x32x24xf32, #tpu.memory_space<vmem>>, vector<1x32x24xf32>
    %22 = vector.shape_cast %21 : vector<1x32x24xf32> to vector<32x24xf32>
    %c1_16 = arith.constant 1 : index
    %c0_17 = arith.constant 0 : index
    %c0_18 = arith.constant 0 : index
    %23 = vector.load %arg5[%c1_16, %c0_17, %c0_18] : memref<2x32x2xf32, #tpu.memory_space<vmem>>, vector<1x32x2xf32>
    %24 = vector.shape_cast %23 : vector<1x32x2xf32> to vector<32x2xf32>
    %25 = vector.extract_strided_slice %22 {offsets = [0, 22], sizes = [32, 2], strides = [1, 1]} : vector<32x24xf32> to vector<32x2xf32>
    %c1_19 = arith.constant 1 : index
    %c0_20 = arith.constant 0 : index
    %c0_21 = arith.constant 0 : index
    %26 = vector.load %arg5[%c1_19, %c0_20, %c0_21] : memref<2x32x2xf32, #tpu.memory_space<vmem>>, vector<1x32x2xf32>
    %27 = vector.shape_cast %26 : vector<1x32x2xf32> to vector<32x2xf32>
    %28 = vector.shape_cast %25 : vector<32x2xf32> to vector<1x32x2xf32>
    tpu.vector_store %arg5[%c1_19, %c0_20, %c0_21], %28 {strides = array<i32>} : memref<2x32x2xf32, #tpu.memory_space<vmem>>, vector<1x32x2xf32>,
    %29 = tpu.concatenate %24, %22 in 1 : vector<32x2xf32>, vector<32x24xf32> -> vector<32x26xf32>
    %30 = vector.extract_strided_slice %29 {offsets = [0, 0], sizes = [32, 24], strides = [1, 1]} : vector<32x26xf32> to vector<32x24xf32>
    %31 = vector.extract_strided_slice %29 {offsets = [0, 1], sizes = [32, 24], strides = [1, 1]} : vector<32x26xf32> to vector<32x24xf32>
    %32 = vector.extract_strided_slice %29 {offsets = [0, 2], sizes = [32, 24], strides = [1, 1]} : vector<32x26xf32> to vector<32x24xf32>
    %33 = tpu.concatenate %30, %31, %32 in 0 : vector<32x24xf32>, vector<32x24xf32>, vector<32x24xf32> -> vector<96x24xf32>
    %cst_22 = arith.constant dense<0.000000e+00> : vector<16x24xf32>
    %34 = tpu.matmul %3, %33, %cst_22 {dimension_numbers = #tpu.dot_dimension_numbers<[1], [0], [0], [1], [0, 0, 1, 1], [], []>} : vector<16x96xf32>, vector<96x24xf32>, vector<16x24xf32> -> vector<16x24xf32>
    %c1_23 = arith.constant 1 : index
    %c0_24 = arith.constant 0 : index
    %c0_25 = arith.constant 0 : index
    %35 = vector.load %arg4[%c1_23, %c0_24, %c0_25] : memref<2x16x24xf32, #tpu.memory_space<vmem>>, vector<1x16x24xf32>
    %36 = vector.shape_cast %35 : vector<1x16x24xf32> to vector<16x24xf32>
    %37 = vector.shape_cast %34 : vector<16x24xf32> to vector<1x16x24xf32>
    tpu.vector_store %arg4[%c1_23, %c0_24, %c0_25], %37 {strides = array<i32>} : memref<2x16x24xf32, #tpu.memory_space<vmem>>, vector<1x16x24xf32>,
    return
  }
  func.func @transform_0(%arg0: i32, %arg1: i32) -> (i32, i32, i32) {
    %c0_i32 = arith.constant 0 : i32
    %c0_i32_0 = arith.constant 0 : i32
    return %arg0, %c0_i32, %arg1 : i32, i32, i32
  }
  func.func @transform_1(%arg0: i32, %arg1: i32) -> (i32, i32) {
    %c0_i32 = arith.constant 0 : i32
    %c0_i32_0 = arith.constant 0 : i32
    %c0_i32_1 = arith.constant 0 : i32
    return %c0_i32, %c0_i32_0 : i32, i32
  }
  func.func @transform_2(%arg0: i32, %arg1: i32) -> (i32, i32, i32) {
    %c0_i32 = arith.constant 0 : i32
    %c0_i32_0 = arith.constant 0 : i32
    return %arg0, %c0_i32, %arg1 : i32, i32, i32
  }
}

</mosaic_0001>

<bundles_post_ra>
// kernel: tpu_custom_call.1
= control target key start
LH: loop header
LB: loop body
LE: loop exit
PB: predicated region body
PF: predicated region fallthrough
CT: control target
= control target key end

     0   :  { %vm16_vm0 = vcmask 15360   ;;  %s473_s13 = smov 2   ;;  %v474_v2 = vmov 0.0   ;;  %s621_s0 = inlined_call_operand.vmem [shape: f32[2,32,24], index: 0, kind: input, shape index: {}]   ;;  %s622_s1 = inlined_call_operand.vmem [shape: f32[16,96], index: 1, kind: input, shape index: {}]   ;;  %s623_s2 = inlined_call_operand.hbm [shape: f32[2,16,24], index: 2, kind: output, shape index: {}]  }
   0x1   :  { %v499_v0 = vld [vmem:[%s621_s0 + $0x18] sm:$0xff]  ;;  %v504_v1 = vld [vmem:[%s621_s0 + $0x10] sm:$0xff]  ;;  %20 = vst.msk [vmem:[#allocation2 + $0x18] sm:$0xff] %vm16_vm0, %v474_v2  ;;  %17 = vst.msk [vmem:[#allocation2] sm:$0xff] %vm16_vm0, %v474_v2 }
   0x2   :  { %62 = vrot.lane.b32.xlu0 %v499_v0, %s473_s13  ;;  %60 = vrot.lane.b32.xlu1 %v504_v1, %s473_s13  ;;  %18 = vst.msk [vmem:[#allocation2 + $0x8] sm:$0xff] %vm16_vm0, %v474_v2  ;;  %19 = vst.msk [vmem:[#allocation2 + $0x10] sm:$0xff] %vm16_vm0, %v474_v2  ;;  %v519_v3 = vld [vmem:[%s621_s0 + $0x38] sm:$0xff]  ;;  %v524_v4 = vld [vmem:[%s621_s0 + $0x30] sm:$0xff] }
   0x3   :  { %21 = vst.msk [vmem:[#allocation2 + $0x20] sm:$0xff] %vm16_vm0, %v474_v2  ;;  %22 = vst.msk [vmem:[#allocation2 + $0x28] sm:$0xff] %vm16_vm0, %v474_v2 }
   0x4   :  { %23 = vst.msk [vmem:[#allocation2 + $0x30] sm:$0xff] %vm16_vm0, %v474_v2  ;;  %24 = vst.msk [vmem:[#allocation2 + $0x38] sm:$0xff] %vm16_vm0, %v474_v2 }
   0x5   :  { %7 = vsyncpa [#allocation4], 0  ;;  %v28_v5 = vld [vmem:[%s621_s0 + $0x8] sm:$0xff]  ;;  %v27_v7 = vld [vmem:[%s621_s0] sm:$0xff]  ;;  %s475_s26 = smov 126   ;;  %vm100_vm1 = vcmask 785408  }
   0x6   :  { %221 = vrot.lane.b32.xlu0 %v519_v3, %s473_s13  ;;  %219 = vrot.lane.b32.xlu1 %v524_v4, %s473_s13  ;;  %v356_v6 = vld [vmem:[%s621_s0 + $0x28] sm:$0xff]  ;;  %v355_v8 = vld [vmem:[%s621_s0 + $0x20] sm:$0xff]  ;;  %s476_s0 = smov 127   ;;  %s477_s29 = smov 106   ;;  %vm182_vm2 = vcmask 195584  }
   0x7   :  { %v25_v33 = vld [vmem:[%s622_s1] sm:$0xff]  ;;  %v26_v51 = vld [vmem:[%s622_s1 + $0x8] sm:$0xff]  ;;  %s478_s1 = smov [#allocation3]  }
   0x8   :  { %v34_v9 = vld [vmem:[#allocation2 + $0x18] sm:$0xff]  ;;  %v31_v26 = vld [vmem:[#allocation2] sm:$0xff]  ;;  %413 = vmatprep.mubr.msk.f32.mxu0 %vm100_vm1, %v25_v33  ;;  %440 = vmatprep.mubr.msk.f32.mxu1 %vm100_vm1, %v25_v33  ;;  %s342_s4 = sshll.u32 %s478_s1, 4  ;;  %s343_s4 = int_to_ptr.vmem [resolvable:$true] %s342_s4 }
   0x9   :  { %v33_v12 = vld [vmem:[#allocation2 + $0x10] sm:$0xff]  ;;  %v32_v20 = vld [vmem:[#allocation2 + $0x8] sm:$0xff]  ;;  %s451_s5 = scalar_lea.vmem %s343_s4, 512  ;;  %p456_p1 = scmp.lt.s32.totalorder %s343_s4, %s343_s4 }
   0xa   :  { %58 = vrot.lane.b32.xlu0 %v28_v5, %s473_s13  ;;  %217 = vrot.lane.b32.xlu1 %v356_v6, %s473_s13  ;;  %v192_v24 = vld [vmem:[#allocation2 + $0x28] sm:$0xff]  ;;  %v191_v30 = vld [vmem:[#allocation2 + $0x20] sm:$0xff]  ;;  %p452_p0 = scmp.ne.s32.totalorder %s343_s4, %s451_s5  ;;  %p457_p2 = scmp.lt.s32.totalorder %s451_s5, %s451_s5 }
   0xb   :  { %v194_v14 = vld [vmem:[#allocation2 + $0x38] sm:$0xff]  ;;  %v193_v18 = vld [vmem:[#allocation2 + $0x30] sm:$0xff] }
   0xc   :  { %p458_p3 = por %p457_p2, %p456_p1 }
   0xe   :  { %56 = vrot.lane.b32.xlu0 %v27_v7, %s473_s13  ;;  %215 = vrot.lane.b32.xlu1 %v355_v8, %s473_s13  ;;  %p459_p4 = pnand %p458_p3, %p452_p0 }
  0x74   :  { %v63_v10 = vpop.permute.xlu0 %62  ;;  %v61_v11 = vpop.permute.xlu1 %60 }
  0x75   :  { %v541_v13 = vsel %vm16_vm0, %v34_v9, %v63_v10  ;;  %v545_v15 = vsel %vm16_vm0, %v33_v12, %v61_v11 }
  0x76   :  { %94 = vrot.lane.b32.xlu0 %v541_v13, %s475_s26 }
  0x78   :  { %v222_v16 = vpop.permute.xlu0 %221  ;;  %v220_v17 = vpop.permute.xlu1 %219 }
  0x79   :  { %v548_v19 = vsel %vm16_vm0, %v194_v14, %v222_v16  ;;  %v553_v21 = vsel %vm16_vm0, %v193_v18, %v220_v17 }
  0x7a   :  { %253 = vrot.lane.b32.xlu1 %v548_v19, %s475_s26  ;;  %92 = vrot.lane.b32.xlu0 %v545_v15, %s475_s26 }
  0x7c   :  { %v59_v22 = vpop.permute.xlu0 %58  ;;  %v218_v23 = vpop.permute.xlu1 %217 }
  0x7d   :  { %v556_v25 = vsel %vm16_vm0, %v32_v20, %v59_v22  ;;  %v561_v27 = vsel %vm16_vm0, %v192_v24, %v218_v23 }
  0x7e   :  { %251 = vrot.lane.b32.xlu1 %v553_v21, %s475_s26  ;;  %90 = vrot.lane.b32.xlu0 %v556_v25, %s475_s26 }
  0x80   :  { %v57_v28 = vpop.permute.xlu0 %56  ;;  %v216_v29 = vpop.permute.xlu1 %215 }
  0x81   :  { %v564_v31 = vsel %vm16_vm0, %v31_v26, %v57_v28  ;;  %v569_v32 = vsel %vm16_vm0, %v191_v30, %v216_v29 }
  0x82   :  { %249 = vrot.lane.b32.xlu1 %v561_v27, %s475_s26  ;;  %88 = vrot.lane.b32.xlu0 %v564_v31, %s475_s26 }
  0x86   :  { %247 = vrot.lane.b32.xlu1 %v569_v32, %s475_s26  ;;  %82 = vrot.lane.b32.xlu0 %v541_v13, %s476_s0 }
  0x8a   :  { %241 = vrot.lane.b32.xlu1 %v548_v19, %s476_s0  ;;  %80 = vrot.lane.b32.xlu0 %v545_v15, %s476_s0 }
  0x8e   :  { %239 = vrot.lane.b32.xlu1 %v553_v21, %s476_s0  ;;  %78 = vrot.lane.b32.xlu0 %v556_v25, %s476_s0 }
  0x92   :  { %237 = vrot.lane.b32.xlu1 %v561_v27, %s476_s0  ;;  %76 = vrot.lane.b32.xlu0 %v564_v31, %s476_s0 }
  0x96   :  { %235 = vrot.lane.b32.xlu1 %v569_v32, %s476_s0  ;;  %39 = vrot.lane.b32.xlu0 %v27_v7, %s477_s29 }
  0x9a   :  { %41 = vrot.lane.b32.xlu1 %v28_v5, %s477_s29  ;;  %43 = vrot.lane.b32.xlu0 %v504_v1, %s477_s29 }
  0x9e   :  { %45 = vrot.lane.b32.xlu1 %v499_v0, %s477_s29  ;;  %199 = vrot.lane.b32.xlu0 %v355_v8, %s477_s29 }
  0xa2   :  { %201 = vrot.lane.b32.xlu1 %v356_v6, %s477_s29  ;;  %203 = vrot.lane.b32.xlu0 %v524_v4, %s477_s29 }
  0xa6   :  { %205 = vrot.lane.b32.xlu1 %v519_v3, %s477_s29 }
  0xe8   :  { %v95_v34 = vpop.permute.xlu0 %94 }
  0xe9   :  { %389 = vmatprep.subr.mxu0 %v95_v34 }
  0xea   :  { %390 = vmatpush3.msra.mxu0 %v95_v34 }
  0xec   :  { %v254_v35 = vpop.permute.xlu1 %253  ;;  %v93_v36 = vpop.permute.xlu0 %92 }
  0xed   :  { %391 = vmatprep.subr.mxu0 %v93_v36  ;;  %416 = vmatprep.subr.mxu1 %v254_v35 }
  0xee   :  { %392 = vmatpush3.msra.mxu0 %v93_v36  ;;  %417 = vmatpush3.msra.mxu1 %v254_v35 }
  0xf0   :  { %v252_v37 = vpop.permute.xlu1 %251  ;;  %v91_v38 = vpop.permute.xlu0 %90 }
  0xf1   :  { %418 = vmatprep.subr.mxu1 %v252_v37  ;;  %393 = vmatprep.subr.mxu0 %v91_v38 }
  0xf2   :  { %419 = vmatpush3.msra.mxu1 %v252_v37  ;;  %394 = vmatpush3.msra.mxu0 %v91_v38 }
  0xf4   :  { %v250_v39 = vpop.permute.xlu1 %249  ;;  %v89_v40 = vpop.permute.xlu0 %88 }
  0xf5   :  { %420 = vmatprep.subr.mxu1 %v250_v39  ;;  %395 = vmatprep.subr.mxu0 %v89_v40 }
  0xf6   :  { %421 = vmatpush3.msra.mxu1 %v250_v39  ;;  %396 = vmatpush3.msra.mxu0 %v89_v40 }
  0xf8   :  { %v248_v41 = vpop.permute.xlu1 %247  ;;  %v83_v42 = vpop.permute.xlu0 %82 }
  0xf9   :  { %397 = vmatprep.subr.mxu0 %v83_v42  ;;  %422 = vmatprep.subr.mxu1 %v248_v41 }
  0xfa   :  { %398 = vmatpush3.msra.mxu0 %v83_v42  ;;  %423 = vmatpush3.msra.mxu1 %v248_v41 }
  0xfc   :  { %v242_v43 = vpop.permute.xlu1 %241  ;;  %v81_v44 = vpop.permute.xlu0 %80 }
  0xfd   :  { %399 = vmatprep.subr.mxu0 %v81_v44  ;;  %424 = vmatprep.subr.mxu1 %v242_v43 }
  0xfe   :  { %400 = vmatpush3.msra.mxu0 %v81_v44  ;;  %425 = vmatpush3.msra.mxu1 %v242_v43 }
 0x100   :  { %v240_v45 = vpop.permute.xlu1 %239  ;;  %v79_v46 = vpop.permute.xlu0 %78 }
 0x101   :  { %401 = vmatprep.subr.mxu0 %v79_v46  ;;  %426 = vmatprep.subr.mxu1 %v240_v45 }
 0x102   :  { %402 = vmatpush3.msra.mxu0 %v79_v46  ;;  %427 = vmatpush3.msra.mxu1 %v240_v45 }
 0x104   :  { %v238_v47 = vpop.permute.xlu1 %237  ;;  %v77_v48 = vpop.permute.xlu0 %76 }
 0x105   :  { %403 = vmatprep.subr.mxu0 %v77_v48  ;;  %428 = vmatprep.subr.mxu1 %v238_v47 }
 0x106   :  { %404 = vmatpush3.msra.mxu0 %v77_v48  ;;  %429 = vmatpush3.msra.mxu1 %v238_v47 }
 0x107   :  { %405 = vmatprep.subr.mxu0 %v541_v13 }
 0x108   :  { %v236_v49 = vpop.permute.xlu1 %235  ;;  %406 = vmatpush3.msra.mxu0 %v541_v13  ;;  %v40_v50 = vpop.permute.xlu0 %39 }
 0x109   :  { %407 = vmatprep.subr.mxu0 %v545_v15  ;;  %430 = vmatprep.subr.mxu1 %v236_v49  ;;  %52 = vst.msk [vmem:[#allocation2] sm:$0xff] %vm16_vm0, %v40_v50 }
 0x10a   :  { %408 = vmatpush3.msra.mxu0 %v545_v15  ;;  %431 = vmatpush3.msra.mxu1 %v236_v49 }
 0x10b   :  { %409 = vmatprep.subr.mxu0 %v556_v25  ;;  %432 = vmatprep.subr.mxu1 %v548_v19 }
 0x10c   :  { %410 = vmatpush3.msra.mxu0 %v556_v25  ;;  %433 = vmatpush3.msra.mxu1 %v548_v19  ;;  %v42_v52 = vpop.permute.xlu1 %41  ;;  %v44_v53 = vpop.permute.xlu0 %43 }
 0x10d   :  { %411 = vmatprep.subr.mxu0 %v564_v31  ;;  %434 = vmatprep.subr.mxu1 %v553_v21  ;;  %53 = vst.msk [vmem:[#allocation2 + $0x8] sm:$0xff] %vm16_vm0, %v42_v52  ;;  %54 = vst.msk [vmem:[#allocation2 + $0x10] sm:$0xff] %vm16_vm0, %v44_v53 }
 0x10e   :  { %412 = vmatpush3.msra.mxu0 %v564_v31  ;;  %435 = vmatpush3.msra.mxu1 %v553_v21 }
 0x10f   :  { %436 = vmatprep.subr.mxu1 %v561_v27  ;;  %414 = vmatmul.mubr.msk.f32.vlgmr.msra.gmra.mxu0 %vm100_vm1, %v26_v51 }
 0x110   :  { %437 = vmatpush3.msra.mxu1 %v561_v27  ;;  %v46_v54 = vpop.permute.xlu1 %45  ;;  %v200_v56 = vpop.permute.xlu0 %199 }
 0x111   :  { %438 = vmatprep.subr.mxu1 %v569_v32  ;;  %55 = vst.msk [vmem:[#allocation2 + $0x18] sm:$0xff] %vm16_vm0, %v46_v54  ;;  %211 = vst.msk [vmem:[#allocation2 + $0x20] sm:$0xff] %vm16_vm0, %v200_v56 }
 0x112   :  { %439 = vmatpush3.msra.mxu1 %v569_v32 }
 0x113   :  { %441 = vmatmul.mubr.msk.f32.vlgmr.msra.gmra.mxu1 %vm100_vm1, %v26_v51 }
 0x114   :  { %v202_v55 = vpop.permute.xlu1 %201  ;;  %v204_v58 = vpop.permute.xlu0 %203 }
 0x115   :  { %212 = vst.msk [vmem:[#allocation2 + $0x28] sm:$0xff] %vm16_vm0, %v202_v55  ;;  %213 = vst.msk [vmem:[#allocation2 + $0x30] sm:$0xff] %vm16_vm0, %v204_v58 }
 0x118   :  { %v206_v57 = vpop.permute.xlu1 %205 }
 0x119   :  { %214 = vst.msk [vmem:[#allocation2 + $0x38] sm:$0xff] %vm16_vm0, %v206_v57 }
 0x1cf   :  { %v415_v59 = vpop.f32.mrf.mxu0 }
 0x1d0   :  { %184 = vst.msk [vmem:[#allocation3 + $0x8] sm:$0xff] %vm182_vm2, %v415_v59 }
 0x1d1   :  { %v173_v60 = vpop.f32.mrf.mxu0 }
 0x1d2   :  { %183 = vst.msk [vmem:[#allocation3] sm:$0xff] %vm182_vm2, %v173_v60 }
 0x1d3   :  { %v442_v61 = vpop.f32.mrf.mxu1 }
 0x1d4   :  { %336 = vst.msk [vmem:[#allocation3 + $0x18] sm:$0xff] %vm182_vm2, %v442_v61 }
 0x1d5   :  { %v325_v62 = vpop.f32.mrf.mxu1 }
 0x1d6   :  { %335 = vst.msk [vmem:[#allocation3 + $0x10] sm:$0xff] %vm182_vm2, %v325_v62 }
 0x1d7   :  { %462 = shalt.err (!%p459_p4)
}
 0x1d8   :  { %s479_s6 = smov 128   ;;  %s480_s7 = smov 8  }
 0x1d9   :  { %348 = dma.vmem_to_hbm [thread:$0]  %s343_s4, 512, %s623_s2, [#allocation4], %s479_s6, %s479_s6, %s480_s7  }
 0x1da   :  { %471 = dma.done.wait [#allocation4], 512  }
 0x1db   :  { %472 = vsyncadd [#allocation4], 4294966784 }
 0x1dc   :  { %352 = vsyncpa [#allocation4], 1 }

</bundles_post_ra>
